<compile_context>
chip_gen: v7x
topology: tpu7x:2x2x1
jax: 0.10.0
libtpu: 0.0.40
codegen_flags: <defaults>
</compile_context>

<pallas_src>
import functools

import jax
import jax.numpy as jnp
from jax.experimental import pallas as pl
from jax.experimental.pallas import tpu as pltpu

HIDDEN = 128
LANE = 128


def _round_up(n, m):
    return ((n + m - 1) // m) * m


def _qnet_kernel(x_ref, w1_ref, b1_ref, w2_ref, b2_ref, w3_ref, b3_ref, o_ref,
                 *, act_dim):
    # x_ref: (TB, obs_dim) f32; w*: bf16 (resident); b*: f32; o_ref: (TB, act_dim) f32.
    x = x_ref[...].astype(jnp.bfloat16)                       # cast in VMEM, not HBM

    h1 = jnp.dot(x, w1_ref[...], preferred_element_type=jnp.float32)
    h1 = jnp.maximum(h1 + b1_ref[...], 0.0)                   # f32 bias + ReLU on VPU

    h2 = jnp.dot(h1.astype(jnp.bfloat16), w2_ref[...],
                 preferred_element_type=jnp.float32)
    h2 = jnp.maximum(h2 + b2_ref[...], 0.0)

    q = jnp.dot(h2.astype(jnp.bfloat16), w3_ref[...],
                preferred_element_type=jnp.float32)
    q = q + b3_ref[...]

    # Lane-dense 128-wide matmul above; only the act_dim useful columns are
    # written back to HBM (smallest possible output stream, no wrapper slice).
    # TODO(synk): a downstream argmax / Q(s,a)-gather could be fused here to
    # shrink the output to 1 lane, but that is outside the module's forward().
    o_ref[...] = q[:, :act_dim].astype(o_ref.dtype)


@functools.partial(jax.jit, static_argnames=("act_dim", "block_rows"))
def qnet_forward(x, w1, b1, w2, b2, w3p, b3p, *, act_dim, block_rows=1024):
    batch, obs_dim = x.shape
    hidden = w1.shape[1]
    n_pad = w3p.shape[1]

    # Row tile: multiple of 16 (bf16 sublane packing), capped by the batch.
    block_rows = max(16, _round_up(block_rows, 16))
    tb = min(block_rows, _round_up(batch, 16))
    # Ensure >=2 grid steps for moderate/large batches so v7x's second
    # TensorCore gets half the rows (harmless on single-TC v5e/v6e).
    if batch >= 512 and pl.cdiv(batch, tb) < 2:
        tb = _round_up(pl.cdiv(batch, 2), 16)

    grid = (pl.cdiv(batch, tb),)   # partial last block handled by Pallas masking

    def const(shape):
        # Weights/biases never change block index -> single-buffered residents.
        return pl.BlockSpec(shape, lambda i: (0, 0), pipeline_mode=pl.Buffered(1))

    return pl.pallas_call(
        functools.partial(_qnet_kernel, act_dim=act_dim),
        out_shape=jax.ShapeDtypeStruct((batch, act_dim), jnp.float32),
        grid_spec=pl.GridSpec(
            grid=grid,
            in_specs=[
                pl.BlockSpec((tb, obs_dim), lambda i: (i, 0)),  # x: row-tiled, unpadded f32
                const((obs_dim, hidden)),    # w1 (bf16, resident in VMEM)
                const((1, hidden)),          # b1 (f32)
                const((hidden, hidden)),     # w2 (bf16)
                const((1, hidden)),          # b2 (f32)
                const((hidden, n_pad)),      # w3, lane-padded to 128 (bf16)
                const((1, n_pad)),           # b3, lane-padded (f32)
            ],
            out_specs=pl.BlockSpec((tb, act_dim), lambda i: (i, 0)),
        ),
        compiler_params=pltpu.CompilerParams(
            dimension_semantics=("parallel",),
            vmem_limit_bytes=32 * 1024 * 1024,
        ),
    )(x, w1, b1, w2, b2, w3p, b3p)


def prepare_qnet_params(w1, b1, w2, b2, w3, b3):
    """One-time parameter prep, hoisted out of the per-step hot path:
    bf16 weight casts for the MXU and lane-padding of the last layer so the
    final matmul stays 128-wide even when act_dim is tiny."""
    hidden = w1.shape[1]
    act_dim = w3.shape[1]
    n_pad = _round_up(act_dim, LANE)
    bf = jnp.bfloat16
    w3p = jnp.zeros((hidden, n_pad), bf).at[:, :act_dim].set(w3.astype(bf))
    b3p = jnp.zeros((1, n_pad), jnp.float32).at[:, :act_dim].set(b3.astype(jnp.float32))
    prepped = (w1.astype(bf), b1.astype(jnp.float32),
               w2.astype(bf), b2.astype(jnp.float32), w3p, b3p)
    return prepped, act_dim


def init_qnet_params(key, obs_dim, act_dim, hidden=HIDDEN):
    """Deterministic init mimicking PyTorch nn.Linear default U(-1/sqrt(fan_in), ..)."""
    keys = jax.random.split(key, 6)

    def linear(kw, kb, fan_in, fan_out):
        bound = 1.0 / jnp.sqrt(jnp.float32(fan_in))
        w = jax.random.uniform(kw, (fan_in, fan_out), jnp.float32, -bound, bound)
        b = jax.random.uniform(kb, (1, fan_out), jnp.float32, -bound, bound)
        return w, b

    w1, b1 = linear(keys[0], keys[1], obs_dim, hidden)
    w2, b2 = linear(keys[2], keys[3], hidden, hidden)
    w3, b3 = linear(keys[4], keys[5], hidden, act_dim)
    return w1, b1, w2, b2, w3, b3


def qnet_reference(x, w1, b1, w2, b2, w3, b3):
    """Exact-f32 reference matching the original PyTorch QNet forward."""
    hi = jax.lax.Precision.HIGHEST
    h1 = jnp.maximum(jnp.dot(x, w1, precision=hi) + b1, 0.0)
    h2 = jnp.maximum(jnp.dot(h1, w2, precision=hi) + b2, 0.0)
    return jnp.dot(h2, w3, precision=hi) + b3


if __name__ == "__main__":
    obs_dim, act_dim = 32, 4
    key = jax.random.PRNGKey(0)
    k_x, k_p = jax.random.split(key, 2)

    raw = init_qnet_params(k_p, obs_dim, act_dim)
    prep, act = prepare_qnet_params(*raw)        # hoisted: done once, not per call

    # Batches: tiny RL step (8), non-multiple-of-tile (260, partial block),
    # and one large enough (600) to produce a >=2-step grid (v7x dual-core path).
    for batch in (8, 260, 600):
        x = jax.random.normal(jax.random.fold_in(k_x, batch),
                              (batch, obs_dim), jnp.float32)
        out = jax.block_until_ready(qnet_forward(x, *prep, act_dim=act))
        ref = qnet_reference(x, *raw)
        assert out.shape == (batch, act_dim)
        # bf16-input / f32-accumulate MXU vs exact-f32 module: ~1e-3 typical,
        # bound comfortably by 2e-2 for unit-scale inputs.
        assert jnp.allclose(out, ref, atol=2e-2, rtol=2e-2), f"mismatch at batch={batch}"

    print("KERNEL_OK")
</pallas_src>

<mosaic_0001>
module attributes {stable_mosaic.version = 11 : i64} {
  func.func @_qnet_kernel(%arg0: i32, %arg1: memref<16x32xf32, #tpu.memory_space<vmem>>, %arg2: memref<32x128xbf16, #tpu.memory_space<vmem>>, %arg3: memref<1x128xf32, #tpu.memory_space<vmem>>, %arg4: memref<128x128xbf16, #tpu.memory_space<vmem>>, %arg5: memref<1x128xf32, #tpu.memory_space<vmem>>, %arg6: memref<128x128xbf16, #tpu.memory_space<vmem>>, %arg7: memref<1x128xf32, #tpu.memory_space<vmem>>, %arg8: memref<16x4xf32, #tpu.memory_space<vmem>>) attributes {dimension_semantics = [#tpu.dimension_semantics<parallel>], iteration_bounds = array<i64: 1>, scalar_prefetch = 0 : i64, scratch_operands = 0 : i64, tpu.core_type = #tpu.core_type<tc>, window_params = [{transform_indices = @transform_0, window_bounds = array<i64: 16, 32>}, {pipeline_mode = #tpu.pipeline_mode<synchronous>, transform_indices = @transform_1, window_bounds = array<i64: 32, 128>}, {pipeline_mode = #tpu.pipeline_mode<synchronous>, transform_indices = @transform_2, window_bounds = array<i64: 1, 128>}, {pipeline_mode = #tpu.pipeline_mode<synchronous>, transform_indices = @transform_3, window_bounds = array<i64: 128, 128>}, {pipeline_mode = #tpu.pipeline_mode<synchronous>, transform_indices = @transform_4, window_bounds = array<i64: 1, 128>}, {pipeline_mode = #tpu.pipeline_mode<synchronous>, transform_indices = @transform_5, window_bounds = array<i64: 128, 128>}, {pipeline_mode = #tpu.pipeline_mode<synchronous>, transform_indices = @transform_6, window_bounds = array<i64: 1, 128>}, {transform_indices = @transform_7, window_bounds = array<i64: 16, 4>}]} {
    %c0 = arith.constant 0 : index
    %c0_0 = arith.constant 0 : index
    %0 = vector.load %arg1[%c0, %c0_0] : memref<16x32xf32, #tpu.memory_space<vmem>>, vector<16x32xf32>
    %1 = arith.truncf %0 : vector<16x32xf32> to vector<16x32xbf16>
    %c0_1 = arith.constant 0 : index
    %c0_2 = arith.constant 0 : index
    %2 = vector.load %arg2[%c0_1, %c0_2] : memref<32x128xbf16, #tpu.memory_space<vmem>>, vector<32x128xbf16>
    %cst = arith.constant dense<0.000000e+00> : vector<16x128xf32>
    %3 = tpu.matmul %1, %2, %cst {dimension_numbers = #tpu.dot_dimension_numbers<[1], [0], [0], [1], [0, 0, 1, 1], [], []>} : vector<16x32xbf16>, vector<32x128xbf16>, vector<16x128xf32> -> vector<16x128xf32>
    %c0_3 = arith.constant 0 : index
    %c0_4 = arith.constant 0 : index
    %4 = vector.load %arg3[%c0_3, %c0_4] : memref<1x128xf32, #tpu.memory_space<vmem>>, vector<1x128xf32>
    %5 = vector.broadcast %4 : vector<1x128xf32> to vector<16x128xf32>
    %6 = arith.addf %3, %5 : vector<16x128xf32>
    %cst_5 = arith.constant 0.000000e+00 : f32
    %7 = vector.broadcast %cst_5 : f32 to vector<16x128xf32>
    %8 = arith.maximumf %6, %7 : vector<16x128xf32>
    %9 = arith.truncf %8 : vector<16x128xf32> to vector<16x128xbf16>
    %c0_6 = arith.constant 0 : index
    %c0_7 = arith.constant 0 : index
    %10 = vector.load %arg4[%c0_6, %c0_7] : memref<128x128xbf16, #tpu.memory_space<vmem>>, vector<128x128xbf16>
    %cst_8 = arith.constant dense<0.000000e+00> : vector<16x128xf32>
    %11 = tpu.matmul %9, %10, %cst_8 {dimension_numbers = #tpu.dot_dimension_numbers<[1], [0], [0], [1], [0, 0, 1, 1], [], []>} : vector<16x128xbf16>, vector<128x128xbf16>, vector<16x128xf32> -> vector<16x128xf32>
    %c0_9 = arith.constant 0 : index
    %c0_10 = arith.constant 0 : index
    %12 = vector.load %arg5[%c0_9, %c0_10] : memref<1x128xf32, #tpu.memory_space<vmem>>, vector<1x128xf32>
    %13 = vector.broadcast %12 : vector<1x128xf32> to vector<16x128xf32>
    %14 = arith.addf %11, %13 : vector<16x128xf32>
    %cst_11 = arith.constant 0.000000e+00 : f32
    %15 = vector.broadcast %cst_11 : f32 to vector<16x128xf32>
    %16 = arith.maximumf %14, %15 : vector<16x128xf32>
    %17 = arith.truncf %16 : vector<16x128xf32> to vector<16x128xbf16>
    %c0_12 = arith.constant 0 : index
    %c0_13 = arith.constant 0 : index
    %18 = vector.load %arg6[%c0_12, %c0_13] : memref<128x128xbf16, #tpu.memory_space<vmem>>, vector<128x128xbf16>
    %cst_14 = arith.constant dense<0.000000e+00> : vector<16x128xf32>
    %19 = tpu.matmul %17, %18, %cst_14 {dimension_numbers = #tpu.dot_dimension_numbers<[1], [0], [0], [1], [0, 0, 1, 1], [], []>} : vector<16x128xbf16>, vector<128x128xbf16>, vector<16x128xf32> -> vector<16x128xf32>
    %c0_15 = arith.constant 0 : index
    %c0_16 = arith.constant 0 : index
    %20 = vector.load %arg7[%c0_15, %c0_16] : memref<1x128xf32, #tpu.memory_space<vmem>>, vector<1x128xf32>
    %21 = vector.broadcast %20 : vector<1x128xf32> to vector<16x128xf32>
    %22 = arith.addf %19, %21 : vector<16x128xf32>
    %23 = vector.extract_strided_slice %22 {offsets = [0, 0], sizes = [16, 4], strides = [1, 1]} : vector<16x128xf32> to vector<16x4xf32>
    %c0_17 = arith.constant 0 : index
    %c0_18 = arith.constant 0 : index
    %24 = vector.load %arg8[%c0_17, %c0_18] : memref<16x4xf32, #tpu.memory_space<vmem>>, vector<16x4xf32>
    tpu.vector_store %arg8[%c0_17, %c0_18], %23 {strides = array<i32>} : memref<16x4xf32, #tpu.memory_space<vmem>>, vector<16x4xf32>,
    return
  }
  func.func @transform_0(%arg0: i32) -> (i32, i32) {
    %c0_i32 = arith.constant 0 : i32
    %c0_i32_0 = arith.constant 0 : i32
    return %arg0, %c0_i32 : i32, i32
  }
  func.func @transform_1(%arg0: i32) -> (i32, i32) {
    %c0_i32 = arith.constant 0 : i32
    %c0_i32_0 = arith.constant 0 : i32
    %c0_i32_1 = arith.constant 0 : i32
    return %c0_i32, %c0_i32_0 : i32, i32
  }
  func.func @transform_2(%arg0: i32) -> (i32, i32) {
    %c0_i32 = arith.constant 0 : i32
    %c0_i32_0 = arith.constant 0 : i32
    %c0_i32_1 = arith.constant 0 : i32
    return %c0_i32, %c0_i32_0 : i32, i32
  }
  func.func @transform_3(%arg0: i32) -> (i32, i32) {
    %c0_i32 = arith.constant 0 : i32
    %c0_i32_0 = arith.constant 0 : i32
    %c0_i32_1 = arith.constant 0 : i32
    return %c0_i32, %c0_i32_0 : i32, i32
  }
  func.func @transform_4(%arg0: i32) -> (i32, i32) {
    %c0_i32 = arith.constant 0 : i32
    %c0_i32_0 = arith.constant 0 : i32
    %c0_i32_1 = arith.constant 0 : i32
    return %c0_i32, %c0_i32_0 : i32, i32
  }
  func.func @transform_5(%arg0: i32) -> (i32, i32) {
    %c0_i32 = arith.constant 0 : i32
    %c0_i32_0 = arith.constant 0 : i32
    %c0_i32_1 = arith.constant 0 : i32
    return %c0_i32, %c0_i32_0 : i32, i32
  }
  func.func @transform_6(%arg0: i32) -> (i32, i32) {
    %c0_i32 = arith.constant 0 : i32
    %c0_i32_0 = arith.constant 0 : i32
    %c0_i32_1 = arith.constant 0 : i32
    return %c0_i32, %c0_i32_0 : i32, i32
  }
  func.func @transform_7(%arg0: i32) -> (i32, i32) {
    %c0_i32 = arith.constant 0 : i32
    %c0_i32_0 = arith.constant 0 : i32
    return %arg0, %c0_i32 : i32, i32
  }
}

</mosaic_0001>

<bundles_post_ra>
// kernel: qnet_forward.1
= control target key start
LH: loop header
LB: loop body
LE: loop exit
PB: predicated region body
PF: predicated region fallthrough
CT: control target
= control target key end

     0   :  { %12 = vsyncpa [#allocation3], 0  ;;  %s792_s0 = inlined_call_operand.hbm [shape: f32[8,32], index: 0, kind: input, shape index: {}]   ;;  %s793_s1 = inlined_call_operand.hbm [shape: bf16[32,128], index: 1, kind: input, shape index: {}]   ;;  %s794_s2 = inlined_call_operand.vmem [shape: f32[1,128], index: 2, kind: input, shape index: {}]   ;;  %s795_s3 = inlined_call_operand.hbm [shape: bf16[128,128], index: 3, kind: input, shape index: {}]   ;;  %s796_s4 = inlined_call_operand.vmem [shape: f32[1,128], index: 4, kind: input, shape index: {}]   ;;  %s797_s5 = inlined_call_operand.hbm [shape: bf16[128,128], index: 5, kind: input, shape index: {}]   ;;  %s798_s6 = inlined_call_operand.vmem [shape: f32[1,128], index: 6, kind: input, shape index: {}]   ;;  %s799_s7 = inlined_call_operand.vmem [shape: f32[8,4], index: 7, kind: output, shape index: {}]  }
   0x1   :  { %13 = vsyncpa [#allocation5], 0 }
   0x2   :  { %14 = vsyncpa [#allocation8], 0 }
   0x3   :  { %19 = vsyncadd [#allocation3], 128  ;;  %s642_s24 = smov [#allocation4]   ;;  %s548_s28 = scalar_lea.hbm %s793_s1, 256 }
   0x4   :  { %s32_s25 = sshll.u32 %s642_s24, 4  ;;  %p549_p0 = scmp.ne.s32.totalorder %s793_s1, %s548_s28  ;;  %s33_s25 = int_to_ptr.vmem [resolvable:$true] %s32_s25 }
   0x5   :  { %p552_p1 = scmp.lt.u32.totalorder %s548_s28, %s793_s1 }
   0x7   :  { %p554_p2 = pnand %p552_p1, %p549_p0 }
   0x9   :  { %557 = shalt.err (!%p554_p2)
}
   0xa   :  { %s558_s10 = scalar_lea.vmem %s33_s25, 256  ;;  %p563_p4 = scmp.lt.s32.totalorder %s33_s25, %s33_s25 }
   0xb   :  { %p559_p3 = scmp.ne.s32.totalorder %s33_s25, %s558_s10  ;;  %p564_p5 = scmp.lt.s32.totalorder %s558_s10, %s558_s10 }
   0xd   :  { %p565_p6 = por %p564_p5, %p563_p4 }
   0xf   :  { %p566_p7 = pnand %p565_p6, %p559_p3 }
  0x11   :  { %569 = shalt.err (!%p566_p7)
}
  0x12   :  { %s643_s11 = smov 64   ;;  %s644_s12 = smov 4  }
  0x13   :  { %38 = dma.hbm_to_vmem [thread:$0]  %s793_s1, 256, %s33_s25, [#allocation5], %s643_s11, %s643_s11, %s644_s12  }
  0x14   :  { %s645_s15 = smov [#allocation2]   ;;  %s570_s19 = scalar_lea.hbm %s792_s0, 128 }
  0x15   :  { %s20_s16 = sshll.u32 %s645_s15, 4  ;;  %p571_p8 = scmp.ne.s32.totalorder %s792_s0, %s570_s19  ;;  %s21_s16 = int_to_ptr.vmem [resolvable:$true] %s20_s16 }
  0x16   :  { %p574_p9 = scmp.lt.u32.totalorder %s570_s19, %s792_s0 }
  0x18   :  { %p576_p10 = pnand %p574_p9, %p571_p8 }
  0x1a   :  { %579 = shalt.err (!%p576_p10)
}
  0x1b   :  { %s580_s24 = scalar_lea.vmem %s21_s16, 128  ;;  %s584_s1 = scalar_lea.vmem %s21_s16, 256 }
  0x1c   :  { %p581_p11 = scmp.ne.s32.totalorder %s21_s16, %s580_s24  ;;  %p585_p12 = scmp.lt.s32.totalorder %s21_s16, %s21_s16 }
  0x1d   :  { %p586_p13 = scmp.lt.s32.totalorder %s584_s1, %s580_s24 }
  0x1f   :  { %p587_p0 = por %p586_p13, %p585_p12 }
  0x21   :  { %p588_p1 = pnand %p587_p0, %p581_p11 }
  0x23   :  { %591 = shalt.err (!%p588_p1)
}
  0x24   :  { %s646_s25 = smov 128   ;;  %s647_s26 = smov 8  }
  0x25   :  { %26 = dma.hbm_to_vmem [thread:$0]  %s792_s0, 128, %s21_s16, [#allocation3], %s646_s25, %s646_s25, %s647_s26  }
  0x26   :  { %s648_s29 = smov [#allocation6]   ;;  %s649_s8 = smov [#allocation7]  }
  0x27   :  { %s46_s30 = sshll.u32 %s648_s29, 4  ;;  %s60_s9 = sshll.u32 %s649_s8, 4  ;;  %s47_s30 = int_to_ptr.vmem [resolvable:$true] %s46_s30  ;;  %s719_s9 = int_to_ptr.vmem [resolvable:$true] %s60_s9 }
  0x28   :  { %s592_s14 = scalar_lea.hbm %s795_s3, 1024 }
  0x29   :  { %p593_p2 = scmp.ne.s32.totalorder %s795_s3, %s592_s14  ;;  %p596_p3 = scmp.lt.u32.totalorder %s592_s14, %s795_s3 }
  0x2b   :  { %p598_p4 = pnand %p596_p3, %p593_p2 }
  0x2d   :  { %601 = shalt.err (!%p598_p4)
}
  0x2e   :  { %s602_s0 = scalar_lea.vmem %s47_s30, 1024  ;;  %p607_p6 = scmp.lt.s32.totalorder %s47_s30, %s47_s30 }
  0x2f   :  { %p603_p5 = scmp.ne.s32.totalorder %s47_s30, %s602_s0  ;;  %p608_p7 = scmp.lt.s32.totalorder %s602_s0, %s602_s0 }
  0x31   :  { %p609_p8 = por %p608_p7, %p607_p6 }
  0x33   :  { %p610_p9 = pnand %p609_p8, %p603_p5 }
  0x35   :  { %613 = shalt.err (!%p610_p9)
}
  0x36   :  { %52 = dma.hbm_to_vmem [thread:$0]  %s795_s3, 1024, %s47_s30, [#allocation5], %s643_s11, %s643_s11, %s644_s12  }
  0x37   :  { %s614_s23 = scalar_lea.hbm %s797_s5, 1024 }
  0x38   :  { %p615_p10 = scmp.ne.s32.totalorder %s797_s5, %s614_s23  ;;  %p618_p11 = scmp.lt.u32.totalorder %s614_s23, %s797_s5 }
  0x3a   :  { %p620_p12 = pnand %p618_p11, %p615_p10 }
  0x3c   :  { %623 = shalt.err (!%p620_p12)
}
  0x3d   :  { %s624_s27 = scalar_lea.vmem %s719_s9, 1024  ;;  %p629_p0 = scmp.lt.s32.totalorder %s719_s9, %s719_s9 }
  0x3e   :  { %p625_p13 = scmp.ne.s32.totalorder %s719_s9, %s624_s27  ;;  %p630_p1 = scmp.lt.s32.totalorder %s624_s27, %s624_s27 }
  0x40   :  { %p631_p2 = por %p630_p1, %p629_p0 }
  0x42   :  { %p632_p3 = pnand %p631_p2, %p625_p13 }
  0x44   :  { %635 = shalt.err (!%p632_p3)
}
  0x45   :  { %66 = dma.hbm_to_vmem [thread:$0]  %s797_s5, 1024, %s719_s9, [#allocation8], %s643_s11, %s643_s11, %s644_s12  }
  0x46   :  { %636 = dma.done.wait [#allocation3], 256  }
  0x47   :  { %637 = vsyncadd [#allocation3], 4294967040 }
  0x48   :  { %638 = dma.done.wait [#allocation5], 1280  }
  0x49   :  { %639 = vsyncadd [#allocation5], 4294966016 }
  0x4a   :  { %640 = dma.done.wait [#allocation8], 1024  }
  0x4b   :  { %641 = vsyncadd [#allocation8], 4294966272  ;;  %v650_v0 = vmov 0.0   ;;  %vm651_vm0 = vmmov 0   ;;  %v530_v1 = vld [vmem:[#allocation4] sm:$0xff]   ;;  %v531_v2 = vld [vmem:[#allocation4 + $0x8] sm:$0xff]  }
  0x4c   :  { %472 = vmatprep.subr.bf16.mxu0 %v650_v0  ;;  %476 = vmatprep.mubr.msk.bf16.mxu0 %vm651_vm0, %v650_v0  ;;  %v82_v3 = vld [vmem:[#allocation2] sm:$0xff]  ;;  %v83_v4 = vld [vmem:[#allocation2 + $0x8] sm:$0xff]  ;;  %vm108_vm1 = vcmask 261120   ;;  %v534_v8 = vld [vmem:[#allocation6 + $0x10] sm:$0xff]   ;;  %vm383_vm2 = vcmask 31744  }
  0x4d   :  { %480 = vmatprep.subr.bf16.mxu1 %v650_v0  ;;  %496 = vmatprep.mubr.msk.bf16.mxu1 %vm651_vm0, %v650_v0  ;;  %v532_v5 = vld [vmem:[#allocation6] sm:$0xff]   ;;  %v84_v6 = vpack.c.bf16 %v83_v4, %v82_v3  ;;  %v533_v7 = vld [vmem:[#allocation6 + $0x8] sm:$0xff]   ;;  %v535_v9 = vld [vmem:[#allocation6 + $0x18] sm:$0xff]  }
  0x4e   :  { %473 = vmatpush3.bf16.msra.mxu0 %v530_v1  ;;  %481 = vmatpush3.bf16.msra.mxu1 %v532_v5  ;;  %v536_v10 = vld [vmem:[#allocation6 + $0x20] sm:$0xff]   ;;  %v537_v11 = vld [vmem:[#allocation6 + $0x28] sm:$0xff]   ;;  %v538_v12 = vld [vmem:[#allocation6 + $0x30] sm:$0xff]  }
  0x4f   :  { %474 = vmatprep.subr.bf16.mxu0 %v650_v0  ;;  %482 = vmatprep.subr.bf16.mxu1 %v650_v0  ;;  %v539_v13 = vld [vmem:[#allocation6 + $0x38] sm:$0xff]   ;;  %v540_v14 = vld [vmem:[#allocation7] sm:$0xff]   ;;  %v541_v15 = vld [vmem:[#allocation7 + $0x8] sm:$0xff]  }
  0x50   :  { %v542_v16 = vld [vmem:[#allocation7 + $0x10] sm:$0xff]   ;;  %v543_v17 = vld [vmem:[#allocation7 + $0x18] sm:$0xff]   ;;  %v544_v18 = vld [vmem:[#allocation7 + $0x20] sm:$0xff]  }
  0x51   :  { %v545_v19 = vld [vmem:[#allocation7 + $0x28] sm:$0xff]   ;;  %v429_v20 = vld [vmem:[%s794_s2] ss:$0 sm:$0xff]  ;;  %v546_v30 = vld [vmem:[#allocation7 + $0x30] sm:$0xff]  }
  0x52   :  { %475 = vmatpush3.bf16.msra.mxu0 %v531_v2  ;;  %483 = vmatpush3.bf16.msra.mxu1 %v533_v7  ;;  %v547_v31 = vld [vmem:[#allocation7 + $0x38] sm:$0xff]   ;;  %v433_v32 = vld [vmem:[%s796_s4] ss:$0 sm:$0xff] }
  0x53   :  { %500 = vmatprep.subr.bf16.mxu0 %v650_v0  ;;  %484 = vmatprep.subr.bf16.mxu1 %v650_v0  ;;  %v442_v42 = vld [vmem:[%s798_s6] ss:$0 sm:$0xff] }
  0x55   :  { %477 = vmatmul.mubr.msk.bf16.vlgmr.msra.gmra.mrb[0].mxu0 %vm108_vm1, %v84_v6 }
  0x56   :  { %516 = vmatprep.mubr.msk.bf16.mxu0 %vm651_vm0, %v650_v0  ;;  %485 = vmatpush3.bf16.msra.mxu1 %v534_v8 }
  0x57   :  { %486 = vmatprep.subr.bf16.mxu1 %v650_v0  ;;  %501 = vmatpush3.bf16.msra.mxu0 %v540_v14 }
  0x58   :  { %502 = vmatprep.subr.bf16.mxu0 %v650_v0 }
  0x5a   :  { %487 = vmatpush3.bf16.msra.mxu1 %v535_v9 }
  0x5b   :  { %488 = vmatprep.subr.bf16.mxu1 %v650_v0  ;;  %503 = vmatpush3.bf16.msra.mxu0 %v541_v15 }
  0x5c   :  { %504 = vmatprep.subr.bf16.mxu0 %v650_v0 }
  0x5e   :  { %489 = vmatpush3.bf16.msra.mxu1 %v536_v10 }
  0x5f   :  { %490 = vmatprep.subr.bf16.mxu1 %v650_v0  ;;  %505 = vmatpush3.bf16.msra.mxu0 %v542_v16 }
  0x60   :  { %506 = vmatprep.subr.bf16.mxu0 %v650_v0 }
  0x62   :  { %491 = vmatpush3.bf16.msra.mxu1 %v537_v11 }
  0x63   :  { %492 = vmatprep.subr.bf16.mxu1 %v650_v0  ;;  %507 = vmatpush3.bf16.msra.mxu0 %v543_v17 }
  0x64   :  { %508 = vmatprep.subr.bf16.mxu0 %v650_v0 }
  0x66   :  { %493 = vmatpush3.bf16.msra.mxu1 %v538_v12 }
  0x67   :  { %494 = vmatprep.subr.bf16.mxu1 %v650_v0  ;;  %509 = vmatpush3.bf16.msra.mxu0 %v544_v18 }
  0x68   :  { %510 = vmatprep.subr.bf16.mxu0 %v650_v0 }
  0x6a   :  { %495 = vmatpush3.bf16.msra.mxu1 %v539_v13 }
  0x6b   :  { %511 = vmatpush3.bf16.msra.mxu0 %v545_v19 }
  0x6c   :  { %512 = vmatprep.subr.bf16.mxu0 %v650_v0 }
  0x6f   :  { %513 = vmatpush3.bf16.msra.mxu0 %v546_v30 }
  0x70   :  { %514 = vmatprep.subr.bf16.mxu0 %v650_v0 }
  0x73   :  { %515 = vmatpush3.bf16.msra.mxu0 %v547_v31 }
 0x128   :  { %v146_v21 = vpop.f32.mrb[0].mxu0 }
 0x129   :  { %v147_v22 = vadd.f32 %v429_v20, %v146_v21  ;;  %v478_v23 = vpop.f32.mrb[1].mxu0 }
 0x12a   :  { %v149_v24 = vpop.f32.mrb[2].mxu0 }
 0x12b   :  { %v150_v25 = vadd.f32 %v429_v20, %v149_v24  ;;  %v479_v26 = vpop.f32.mrb[3].mxu0  ;;  %v153_v27 = vmax.f32 %v147_v22, 0.0 }
 0x12d   :  { %v154_v28 = vmax.f32 %v150_v25, 0.0 }
 0x12f   :  { %v155_v29 = vpack.c.bf16 %v154_v28, %v153_v27 }
 0x131   :  { %497 = vmatmul.mubr.bf16.vlgmr.msra.gmra.mrb[0].mxu1 %v155_v29 }
 0x204   :  { %v261_v33 = vpop.f32.mrb[0].mxu1 }
 0x205   :  { %v262_v34 = vadd.f32 %v433_v32, %v261_v33  ;;  %v498_v35 = vpop.f32.mrb[1].mxu1 }
 0x206   :  { %v264_v36 = vpop.f32.mrb[2].mxu1 }
 0x207   :  { %v265_v37 = vadd.f32 %v433_v32, %v264_v36  ;;  %v499_v38 = vpop.f32.mrb[3].mxu1  ;;  %v268_v39 = vmax.f32 %v262_v34, 0.0 }
 0x209   :  { %v269_v40 = vmax.f32 %v265_v37, 0.0 }
 0x20b   :  { %v270_v41 = vpack.c.bf16 %v269_v40, %v268_v39 }
 0x20d   :  { %517 = vmatmul.mubr.bf16.vlgmr.msra.gmra.mrb[4].mxu0 %v270_v41 }
 0x2e0   :  { %v376_v43 = vpop.f32.mrb[4].mxu0 }
 0x2e1   :  { %v377_v44 = vadd.f32 %v442_v42, %v376_v43  ;;  %v518_v45 = vpop.f32.mrb[5].mxu0 }
 0x2e2   :  { %v379_v46 = vpop.f32.mrb[6].mxu0 }
 0x2e3   :  { %384 = vst.msk [vmem:[#allocation9] sm:$0xff] %vm383_vm2, %v377_v44  ;;  %v519_v47 = vpop.f32.mrb[7].mxu0 }
 0x2ea   :  { %v415_v48 = vld [vmem:[#allocation9] sm:$0xff] }
 0x2eb   :  { %416 = vst [vmem:[%s799_s7] sm:$0xff] %v415_v48 }
 0x2ec   :  { %422 = vsyncpa [#allocation3], 1 }
 0x2ed   :  { %423 = vsyncpa [#allocation5], 1 }
 0x2ee   :  { %424 = vsyncpa [#allocation8], 1 }

</bundles_post_ra>
